<compile_context>
chip_gen: v6e
topology: v6e:2x2x1
jax: 0.10.0
libtpu: 0.0.40
codegen_flags: <defaults>
</compile_context>

<pallas_src>
import functools

import jax
import jax.numpy as jnp
from jax.experimental import pallas as pl
from jax.experimental.pallas import tpu as pltpu


def _round_up(n, m):
    return ((n + m - 1) // m) * m


# ---------------------------------------------------------------------------
# Fused Pallas kernel: the whole MLP forward in one invocation.
# Ref order: x, wt_0..wt_{L-1}, [b_0..b_{L-1}], [g_0.., be_0..], alphas(SMEM), out
# ---------------------------------------------------------------------------
def _mlp_fused_kernel(*refs, n_layers, use_bn, use_bias, l2norm, eps):
    idx = 0
    x_ref = refs[idx]; idx += 1
    wt_refs = refs[idx:idx + n_layers]; idx += n_layers
    if use_bias:
        b_refs = refs[idx:idx + n_layers]; idx += n_layers
    if use_bn:
        g_refs = refs[idx:idx + n_layers]; idx += n_layers
        be_refs = refs[idx:idx + n_layers]; idx += n_layers
    alpha_ref = refs[idx]; idx += 1          # (n_layers,) f32 in SMEM
    o_ref = refs[idx]

    h = x_ref[...].astype(jnp.float32)                       # (B, Fin_pad) f32
    for i in range(n_layers):
        # Linear on the MXU: bf16 x bf16 -> f32 accumulate (weights stored bf16; the
        # activation is cast in-register).  Bias is only added when BN is absent, since
        # BN with batch statistics cancels a per-feature constant bias exactly.
        z = jnp.dot(h.astype(jnp.bfloat16), wt_refs[i][...],
                    preferred_element_type=jnp.float32)      # (B, Fout_pad) f32
        if use_bias:
            z = z + b_refs[i][...]

        if use_bn:
            # BatchNorm1d, training mode: batch mean / biased variance over batch axis (f32).
            mean = jnp.mean(z, axis=0, keepdims=True)
            diff = z - mean
            var = jnp.mean(diff * diff, axis=0, keepdims=True)
            z = diff * jax.lax.rsqrt(var + eps) * g_refs[i][...] + be_refs[i][...]

        if i + 1 != n_layers:
            # PReLU with a single shared alpha (scalar read from SMEM).
            alpha = alpha_ref[i]
            z = jnp.where(z > 0, z, alpha * z)

        if l2norm:
            # F.normalize(x, p=2, dim=1): clamp the squared norm, single rsqrt (EUP).
            sumsq = jnp.sum(z * z, axis=1, keepdims=True)
            z = z * jax.lax.rsqrt(jnp.maximum(sumsq, 1e-24))

        h = z

    o_ref[...] = h.astype(o_ref.dtype)


# ---------------------------------------------------------------------------
# MLP module (parameter container + fused forward)
# ---------------------------------------------------------------------------
class MLPPallas:
    def __init__(self, c_dim_list, key, act='prelu', batchnorm=True,
                 dropout=0.0, l2norm=False, dims=None, eps=1e-5):
        assert isinstance(c_dim_list, list)
        assert act == 'prelu'
        assert dropout == 0.0          # Dropout(0.0) == Identity in the forward pass
        self.n_layers = len(c_dim_list) - 1
        self.batchnorm = batchnorm
        self.has_l2norm = l2norm
        self.dims = dims
        self.eps = eps
        self.c_dim_list = list(c_dim_list)

        # ---- original (PyTorch-layout) parameters, used by the pure-JAX reference ----
        self.params = []
        for c_in, c_out in zip(c_dim_list[:-1], c_dim_list[1:]):
            key, kw, kb = jax.random.split(key, 3)
            bound = 1.0 / float(c_in) ** 0.5
            w = jax.random.uniform(kw, (c_out, c_in), jnp.float32, -bound, bound)
            b = jax.random.uniform(kb, (c_out,), jnp.float32, -bound, bound)
            gamma = jnp.ones((c_out,), jnp.float32)       # BatchNorm1d weight init
            beta = jnp.zeros((c_out,), jnp.float32)       # BatchNorm1d bias init
            alpha = jnp.full((1,), 0.25, jnp.float32)     # PReLU init
            self.params.append((w, b, gamma, beta, alpha))

        # ---- kernel-side parameters: pre-transposed (Fin_pad, Fout_pad), zero-padded to
        #      lane-dense (multiple-of-128) feature dims, and stored as bf16 (MXU-native),
        #      all done ONCE at init ----
        self.fin0_pad = _round_up(c_dim_list[0], 128)
        self.fpad = [_round_up(c, 128) for c in c_dim_list[1:]]
        self.wt_pad, self.b_pad, self.g_pad, self.be_pad = [], [], [], []
        alphas = []
        for i, (w, b, gamma, beta, alpha) in enumerate(self.params):
            c_out, c_in = w.shape
            fin_p = self.fin0_pad if i == 0 else self.fpad[i - 1]
            fout_p = self.fpad[i]
            wt = (jnp.zeros((fin_p, fout_p), jnp.float32)
                  .at[:c_in, :c_out].set(w.T)
                  .astype(jnp.bfloat16))
            self.wt_pad.append(wt)
            self.b_pad.append(jnp.zeros((1, fout_p), jnp.float32).at[0, :c_out].set(b))
            self.g_pad.append(jnp.ones((1, fout_p), jnp.float32).at[0, :c_out].set(gamma))
            self.be_pad.append(jnp.zeros((1, fout_p), jnp.float32).at[0, :c_out].set(beta))
            alphas.append(alpha[0])
        self.alphas = jnp.asarray(alphas, jnp.float32)    # (n_layers,) -> SMEM

    def _cost_and_vmem(self, B, use_bias):
        # FLOPs of the padded matmuls, transcendentals (BN + L2 rsqrts), bytes touched.
        fins = [self.fin0_pad] + self.fpad[:-1]
        flops = sum(2 * B * fi * fo for fi, fo in zip(fins, self.fpad))
        transcendentals = 0
        if self.batchnorm:
            transcendentals += sum(self.fpad)
        if self.has_l2norm:
            transcendentals += B * self.n_layers
        bytes_in = B * self.fin0_pad * 4                      # x (f32)
        bytes_in += sum(int(w.size) * 2 for w in self.wt_pad)  # weights (bf16)
        if use_bias:
            bytes_in += sum(int(b.size) * 4 for b in self.b_pad)
        if self.batchnorm:
            bytes_in += sum(int(g.size) * 4 for g in self.g_pad)
            bytes_in += sum(int(be.size) * 4 for be in self.be_pad)
        bytes_in += int(self.alphas.size) * 4
        bytes_out = B * self.fpad[-1] * 4
        bytes_accessed = bytes_in + bytes_out

        # Right-size the VMEM request: operands + output + generous headroom for compiler
        # scratch / intermediates, capped well below v7x's 64 MiB/TC physical VMEM.
        vmem_limit = min(48 * 1024 * 1024,
                         max(4 * 1024 * 1024, 4 * bytes_accessed + (1 << 20)))
        cost = pl.CostEstimate(flops=int(flops),
                               transcendentals=int(transcendentals),
                               bytes_accessed=int(bytes_accessed))
        return cost, int(vmem_limit)

    def forward(self, x):
        B = x.shape[0]
        h = x.reshape(B, -1).astype(jnp.float32)
        fin = h.shape[1]
        if fin != self.fin0_pad:
            # Lane-dense input: pad the flattened feature dim to a multiple of 128.
            # Padded columns multiply zero weight rows, so the result is unchanged.
            h = jnp.pad(h, ((0, 0), (0, self.fin0_pad - fin)))
        use_bias = not self.batchnorm
        fout_pad = self.fpad[-1]

        inputs = [h] + list(self.wt_pad)
        specs = [pl.BlockSpec(h.shape, lambda: (0, 0))]
        specs += [pl.BlockSpec(w.shape, lambda: (0, 0)) for w in self.wt_pad]
        if use_bias:
            inputs += list(self.b_pad)
            specs += [pl.BlockSpec(b.shape, lambda: (0, 0)) for b in self.b_pad]
        if self.batchnorm:
            inputs += list(self.g_pad) + list(self.be_pad)
            specs += [pl.BlockSpec(g.shape, lambda: (0, 0)) for g in self.g_pad]
            specs += [pl.BlockSpec(be.shape, lambda: (0, 0)) for be in self.be_pad]
        inputs.append(self.alphas)
        specs.append(pl.BlockSpec(memory_space=pltpu.MemorySpace.SMEM))

        kernel = functools.partial(
            _mlp_fused_kernel,
            n_layers=self.n_layers, use_bn=self.batchnorm,
            use_bias=use_bias, l2norm=self.has_l2norm, eps=self.eps)

        cost, vmem_limit = self._cost_and_vmem(B, use_bias)

        # Single grid point; every operand is a full-array VMEM block (shapes are tiny),
        # weights ride in bf16, the PReLU alphas ride in SMEM, and the output is
        # lane-dense (padded to a 128 multiple).
        out_pad = pl.pallas_call(
            kernel,
            out_shape=jax.ShapeDtypeStruct((B, fout_pad), jnp.float32),
            in_specs=specs,
            out_specs=pl.BlockSpec((B, fout_pad), lambda: (0, 0)),
            compiler_params=pltpu.CompilerParams(vmem_limit_bytes=vmem_limit),
            cost_estimate=cost,
        )(*inputs)

        out = out_pad[:, :self.c_dim_list[-1]]
        if self.dims is not None:
            out = out.reshape(B, *self.dims)
        return out


# ---------------------------------------------------------------------------
# Pure-JAX reference (mirrors PyTorch in f32, including the redundant Linear bias)
# ---------------------------------------------------------------------------
def reference_forward(mlp, x):
    batch_size = x.shape[0]
    h = x.reshape(batch_size, -1).astype(jnp.float32)
    for i, (w, b, gamma, beta, alpha) in enumerate(mlp.params):
        h = h @ w.T + b
        if mlp.batchnorm:
            mean = jnp.mean(h, axis=0, keepdims=True)
            var = jnp.mean((h - mean) ** 2, axis=0, keepdims=True)
            h = (h - mean) / jnp.sqrt(var + 1e-5) * gamma + beta
        if (i + 1) != mlp.n_layers:
            h = jnp.where(h > 0, h, alpha[0] * h)
        if mlp.has_l2norm:
            n = jnp.sqrt(jnp.sum(h * h, axis=1, keepdims=True))
            h = h / jnp.maximum(n, 1e-12)
    if mlp.dims is not None:
        h = h.reshape(h.shape[0], *mlp.dims)
    return h


if __name__ == "__main__":
    key = jax.random.PRNGKey(0)
    k_in, k_params = jax.random.split(key)

    # Input: (batch=8, 4, 16) -> flattened to 64 features inside forward.
    x = jax.random.normal(k_in, (8, 4, 16), jnp.float32)

    # MLP: 64 -> 32 -> 16, PReLU + BatchNorm on hidden layer, final reshape to (4, 4).
    mlp = MLPPallas([64, 32, 16], key=k_params, act='prelu',
                    batchnorm=True, dropout=0.0, l2norm=True, dims=(4, 4))

    out = jax.block_until_ready(mlp.forward(x))
    ref = jax.block_until_ready(reference_forward(mlp, x))

    assert out.shape == (8, 4, 4), out.shape
    # Tolerance loosened vs. the pure-f32 version: the kernel runs the matmuls with bf16
    # weights/activations (f32 accumulate), so expect ~1e-3..1e-2 deviations from the f32 ref.
    err = float(jnp.max(jnp.abs(out - ref)))
    assert jnp.allclose(out, ref, atol=3e-2, rtol=3e-2), err

    print("KERNEL_OK")
</pallas_src>

<mosaic_0001>
module attributes {stable_mosaic.version = 11 : i64} {
  func.func @_mlp_fused_kernel(%arg0: memref<8x128xf32, #tpu.memory_space<vmem>>, %arg1: memref<128x128xbf16, #tpu.memory_space<vmem>>, %arg2: memref<128x128xbf16, #tpu.memory_space<vmem>>, %arg3: memref<1x128xf32, #tpu.memory_space<vmem>>, %arg4: memref<1x128xf32, #tpu.memory_space<vmem>>, %arg5: memref<1x128xf32, #tpu.memory_space<vmem>>, %arg6: memref<1x128xf32, #tpu.memory_space<vmem>>, %arg7: memref<2xf32, #tpu.memory_space<smem>>, %arg8: memref<8x128xf32, #tpu.memory_space<vmem>>) attributes {dimension_semantics = [], scalar_prefetch = 0 : i64, scratch_operands = 0 : i64, tpu.core_type = #tpu.core_type<tc>} {
    %c0 = arith.constant 0 : index
    %c0_0 = arith.constant 0 : index
    %0 = vector.load %arg0[%c0, %c0_0] : memref<8x128xf32, #tpu.memory_space<vmem>>, vector<8x128xf32>
    %1 = arith.truncf %0 : vector<8x128xf32> to vector<8x128xbf16>
    %c0_1 = arith.constant 0 : index
    %c0_2 = arith.constant 0 : index
    %2 = vector.load %arg1[%c0_1, %c0_2] : memref<128x128xbf16, #tpu.memory_space<vmem>>, vector<128x128xbf16>
    %cst = arith.constant dense<0.000000e+00> : vector<8x128xf32>
    %3 = tpu.matmul %1, %2, %cst {dimension_numbers = #tpu.dot_dimension_numbers<[1], [0], [0], [1], [0, 0, 1, 1], [], []>} : vector<8x128xbf16>, vector<128x128xbf16>, vector<8x128xf32> -> vector<8x128xf32>
    %cst_3 = arith.constant dense<0.000000e+00> : vector<128xf32>
    %4 = vector.multi_reduction <add>, %3, %cst_3 [0] : vector<8x128xf32> to vector<128xf32>
    %5 = vector.shape_cast %4 : vector<128xf32> to vector<1x128xf32>
    %cst_4 = arith.constant 8.000000e+00 : f32
    %6 = vector.broadcast %cst_4 : f32 to vector<1x128xf32>
    %7 = arith.divf %5, %6 : vector<1x128xf32>
    %8 = vector.broadcast %7 : vector<1x128xf32> to vector<8x128xf32>
    %9 = arith.subf %3, %8 : vector<8x128xf32>
    %10 = arith.mulf %9, %9 : vector<8x128xf32>
    %cst_5 = arith.constant dense<0.000000e+00> : vector<128xf32>
    %11 = vector.multi_reduction <add>, %10, %cst_5 [0] : vector<8x128xf32> to vector<128xf32>
    %12 = vector.shape_cast %11 : vector<128xf32> to vector<1x128xf32>
    %cst_6 = arith.constant 8.000000e+00 : f32
    %13 = vector.broadcast %cst_6 : f32 to vector<1x128xf32>
    %14 = arith.divf %12, %13 : vector<1x128xf32>
    %cst_7 = arith.constant 9.99999974E-6 : f32
    %15 = vector.broadcast %cst_7 : f32 to vector<1x128xf32>
    %16 = arith.addf %14, %15 : vector<1x128xf32>
    %17 = math.rsqrt %16 : vector<1x128xf32>
    %18 = vector.broadcast %17 : vector<1x128xf32> to vector<8x128xf32>
    %19 = arith.mulf %9, %18 : vector<8x128xf32>
    %c0_8 = arith.constant 0 : index
    %c0_9 = arith.constant 0 : index
    %20 = vector.load %arg3[%c0_8, %c0_9] : memref<1x128xf32, #tpu.memory_space<vmem>>, vector<1x128xf32>
    %21 = vector.broadcast %20 : vector<1x128xf32> to vector<8x128xf32>
    %22 = arith.mulf %19, %21 : vector<8x128xf32>
    %c0_10 = arith.constant 0 : index
    %c0_11 = arith.constant 0 : index
    %23 = vector.load %arg5[%c0_10, %c0_11] : memref<1x128xf32, #tpu.memory_space<vmem>>, vector<1x128xf32>
    %24 = vector.broadcast %23 : vector<1x128xf32> to vector<8x128xf32>
    %25 = arith.addf %22, %24 : vector<8x128xf32>
    %c0_12 = arith.constant 0 : index
    %26 = memref.load %arg7[%c0_12] : memref<2xf32, #tpu.memory_space<smem>>
    %cst_13 = arith.constant 0.000000e+00 : f32
    %27 = vector.broadcast %cst_13 : f32 to vector<8x128xf32>
    %28 = arith.cmpf ogt, %25, %27 : vector<8x128xf32>
    %29 = vector.broadcast %26 : f32 to vector<8x128xf32>
    %30 = arith.mulf %29, %25 : vector<8x128xf32>
    %31 = arith.select %28, %25, %30 : vector<8x128xi1>, vector<8x128xf32>
    %32 = arith.mulf %31, %31 : vector<8x128xf32>
    %cst_14 = arith.constant dense<0.000000e+00> : vector<8xf32>
    %33 = vector.multi_reduction <add>, %32, %cst_14 [1] : vector<8x128xf32> to vector<8xf32>
    %34 = vector.shape_cast %33 : vector<8xf32> to vector<8x1xf32>
    %cst_15 = arith.constant 1.000000e-24 : f32
    %35 = vector.broadcast %cst_15 : f32 to vector<8x1xf32>
    %36 = arith.maximumf %34, %35 : vector<8x1xf32>
    %37 = math.rsqrt %36 : vector<8x1xf32>
    %38 = vector.broadcast %37 : vector<8x1xf32> to vector<8x128xf32>
    %39 = arith.mulf %31, %38 : vector<8x128xf32>
    %40 = arith.truncf %39 : vector<8x128xf32> to vector<8x128xbf16>
    %c0_16 = arith.constant 0 : index
    %c0_17 = arith.constant 0 : index
    %41 = vector.load %arg2[%c0_16, %c0_17] : memref<128x128xbf16, #tpu.memory_space<vmem>>, vector<128x128xbf16>
    %cst_18 = arith.constant dense<0.000000e+00> : vector<8x128xf32>
    %42 = tpu.matmul %40, %41, %cst_18 {dimension_numbers = #tpu.dot_dimension_numbers<[1], [0], [0], [1], [0, 0, 1, 1], [], []>} : vector<8x128xbf16>, vector<128x128xbf16>, vector<8x128xf32> -> vector<8x128xf32>
    %cst_19 = arith.constant dense<0.000000e+00> : vector<128xf32>
    %43 = vector.multi_reduction <add>, %42, %cst_19 [0] : vector<8x128xf32> to vector<128xf32>
    %44 = vector.shape_cast %43 : vector<128xf32> to vector<1x128xf32>
    %cst_20 = arith.constant 8.000000e+00 : f32
    %45 = vector.broadcast %cst_20 : f32 to vector<1x128xf32>
    %46 = arith.divf %44, %45 : vector<1x128xf32>
    %47 = vector.broadcast %46 : vector<1x128xf32> to vector<8x128xf32>
    %48 = arith.subf %42, %47 : vector<8x128xf32>
    %49 = arith.mulf %48, %48 : vector<8x128xf32>
    %cst_21 = arith.constant dense<0.000000e+00> : vector<128xf32>
    %50 = vector.multi_reduction <add>, %49, %cst_21 [0] : vector<8x128xf32> to vector<128xf32>
    %51 = vector.shape_cast %50 : vector<128xf32> to vector<1x128xf32>
    %cst_22 = arith.constant 8.000000e+00 : f32
    %52 = vector.broadcast %cst_22 : f32 to vector<1x128xf32>
    %53 = arith.divf %51, %52 : vector<1x128xf32>
    %cst_23 = arith.constant 9.99999974E-6 : f32
    %54 = vector.broadcast %cst_23 : f32 to vector<1x128xf32>
    %55 = arith.addf %53, %54 : vector<1x128xf32>
    %56 = math.rsqrt %55 : vector<1x128xf32>
    %57 = vector.broadcast %56 : vector<1x128xf32> to vector<8x128xf32>
    %58 = arith.mulf %48, %57 : vector<8x128xf32>
    %c0_24 = arith.constant 0 : index
    %c0_25 = arith.constant 0 : index
    %59 = vector.load %arg4[%c0_24, %c0_25] : memref<1x128xf32, #tpu.memory_space<vmem>>, vector<1x128xf32>
    %60 = vector.broadcast %59 : vector<1x128xf32> to vector<8x128xf32>
    %61 = arith.mulf %58, %60 : vector<8x128xf32>
    %c0_26 = arith.constant 0 : index
    %c0_27 = arith.constant 0 : index
    %62 = vector.load %arg6[%c0_26, %c0_27] : memref<1x128xf32, #tpu.memory_space<vmem>>, vector<1x128xf32>
    %63 = vector.broadcast %62 : vector<1x128xf32> to vector<8x128xf32>
    %64 = arith.addf %61, %63 : vector<8x128xf32>
    %65 = arith.mulf %64, %64 : vector<8x128xf32>
    %cst_28 = arith.constant dense<0.000000e+00> : vector<8xf32>
    %66 = vector.multi_reduction <add>, %65, %cst_28 [1] : vector<8x128xf32> to vector<8xf32>
    %67 = vector.shape_cast %66 : vector<8xf32> to vector<8x1xf32>
    %cst_29 = arith.constant 1.000000e-24 : f32
    %68 = vector.broadcast %cst_29 : f32 to vector<8x1xf32>
    %69 = arith.maximumf %67, %68 : vector<8x1xf32>
    %70 = math.rsqrt %69 : vector<8x1xf32>
    %71 = vector.broadcast %70 : vector<8x1xf32> to vector<8x128xf32>
    %72 = arith.mulf %64, %71 : vector<8x128xf32>
    %c0_30 = arith.constant 0 : index
    %c0_31 = arith.constant 0 : index
    %73 = vector.load %arg8[%c0_30, %c0_31] : memref<8x128xf32, #tpu.memory_space<vmem>>, vector<8x128xf32>
    tpu.vector_store %arg8[%c0_30, %c0_31], %72 {strides = array<i32>} : memref<8x128xf32, #tpu.memory_space<vmem>>, vector<8x128xf32>,
    return
  }
}

</mosaic_0001>

<bundles_post_ra>
// kernel: tpu_custom_call.1
= control target key start
LH: loop header
LB: loop body
LE: loop exit
PB: predicated region body
PF: predicated region fallthrough
CT: control target
= control target key end

     0   :  { %13 = vsyncpa [#allocation3], 0  ;;  %s710_s0 = inlined_call_operand.hbm [shape: f32[8,128], index: 0, kind: input, shape index: {}]   ;;  %s711_s1 = inlined_call_operand.hbm [shape: bf16[128,128], index: 1, kind: input, shape index: {}]   ;;  %s712_s2 = inlined_call_operand.hbm [shape: bf16[128,128], index: 2, kind: input, shape index: {}]   ;;  %s713_s3 = inlined_call_operand.vmem [shape: f32[1,128], index: 3, kind: input, shape index: {}]   ;;  %s714_s4 = inlined_call_operand.vmem [shape: f32[1,128], index: 4, kind: input, shape index: {}]   ;;  %s715_s5 = inlined_call_operand.vmem [shape: f32[1,128], index: 5, kind: input, shape index: {}]   ;;  %s716_s6 = inlined_call_operand.vmem [shape: f32[1,128], index: 6, kind: input, shape index: {}]   ;;  %s717_s7 = inlined_call_operand.vmem [shape: f32[2], index: 7, kind: input, shape index: {}]   ;;  %s718_s8 = inlined_call_operand.hbm [shape: f32[8,128], index: 8, kind: output, shape index: {}]  }
   0x1   :  { %14 = vsyncpa [#allocation7], 0 }
   0x2   :  { %15 = vsyncpa [#allocation5], 0 }
   0x3   :  { %16 = vsyncpa [#allocation4], 0  ;;  %s611_s27 = smov [#allocation6]  }
   0x4   :  { %s32_s28 = sshll.u32 %s611_s27, 4  ;;  %s33_s28 = int_to_ptr.vmem [resolvable:$true] %s32_s28 }
   0x5   :  { %s519_s29 = scalar_lea.vmem %s33_s28, 1024  ;;  %p524_p1 = scmp.lt.s32.totalorder %s33_s28, %s33_s28 }
   0x6   :  { %p520_p0 = scmp.ne.s32.totalorder %s33_s28, %s519_s29  ;;  %p525_p2 = scmp.lt.s32.totalorder %s519_s29, %s519_s29 }
   0x8   :  { %p526_p3 = por %p525_p2, %p524_p1 }
   0xa   :  { %p527_p4 = pnand %p526_p3, %p520_p0 }
   0xc   :  { %530 = shalt.err (!%p527_p4)
}
   0xd   :  { %s612_s30 = smov 64   ;;  %s613_s9 = smov 4  }
   0xe   :  { %38 = dma.hbm_to_vmem [thread:$0]  %s711_s1, 1024, %s33_s28, [#allocation7], %s612_s30, %s612_s30, %s613_s9  }
   0xf   :  { %s614_s12 = smov [#allocation2]   ;;  %s615_s14 = smov [#allocation8]  }
  0x10   :  { %s23_s13 = sshll.u32 %s614_s12, 4  ;;  %s44_s15 = sshll.u32 %s615_s14, 4  ;;  %s24_s13 = int_to_ptr.vmem [resolvable:$true] %s23_s13  ;;  %s45_s15 = int_to_ptr.vmem [resolvable:$true] %s44_s15 }
  0x11   :  { %s539_s16 = scalar_lea.vmem %s24_s13, 128  ;;  %p544_p6 = scmp.lt.s32.totalorder %s24_s13, %s24_s13 }
  0x12   :  { %p540_p5 = scmp.ne.s32.totalorder %s24_s13, %s539_s16  ;;  %p545_p7 = scmp.lt.s32.totalorder %s539_s16, %s539_s16 }
  0x14   :  { %p546_p8 = por %p545_p7, %p544_p6 }
  0x16   :  { %p547_p9 = pnand %p546_p8, %p540_p5 }
  0x18   :  { %550 = shalt.err (!%p547_p9)
}
  0x19   :  { %26 = dma.hbm_to_vmem [thread:$0]  %s710_s0, 128, %s24_s13, [#allocation3]  }
  0x1a   :  { %s65_s1 = sshll.u32 %s717_s7, 4  ;;  %s559_s21 = scalar_lea.vmem %s45_s15, 1024  ;;  %s66_s1 = int_to_ptr.vmem [resolvable:$true] %s65_s1 }
  0x1b   :  { %p560_p10 = scmp.ne.s32.totalorder %s45_s15, %s559_s21  ;;  %p564_p11 = scmp.lt.s32.totalorder %s45_s15, %s45_s15 }
  0x1c   :  { %p565_p12 = scmp.lt.s32.totalorder %s559_s21, %s559_s21 }
  0x1e   :  { %p566_p13 = por %p565_p12, %p564_p11 }
  0x20   :  { %p567_p0 = pnand %p566_p13, %p560_p10 }
  0x22   :  { %570 = shalt.err (!%p567_p0)
}
  0x23   :  { %50 = dma.hbm_to_vmem [thread:$0]  %s712_s2, 1024, %s45_s15, [#allocation7], %s612_s30, %s612_s30, %s613_s9  }
  0x24   :  { %s571_s24 = scalar_lea.vmem %s66_s1, 16  ;;  %p576_p2 = scmp.lt.s32.totalorder %s66_s1, %s66_s1 }
  0x25   :  { %p572_p1 = scmp.ne.s32.totalorder %s66_s1, %s571_s24  ;;  %p577_p3 = scmp.lt.s32.totalorder %s571_s24, %s571_s24 }
  0x27   :  { %p578_p4 = por %p577_p3, %p576_p2 }
  0x29   :  { %p579_p5 = pnand %p578_p4, %p572_p1 }
  0x2b   :  { %582 = shalt.err (!%p579_p5)
}
  0x2c   :  { %s616_s0 = smov [#allocation9]  }
  0x2d   :  { %68 = dma.vmem_to_smem %s66_s1, 16, %s616_s0, [#allocation5]  }
  0x2e   :  { %603 = dma.done.wait [#allocation3], 128  }
  0x2f   :  { %604 = vsyncadd [#allocation3], 4294967168 }
  0x30   :  { %605 = dma.done.wait [#allocation7], 2048  }
  0x31   :  { %606 = vsyncadd [#allocation7], 4294965248 }
  0x32   :  { %607 = dma.done.wait [#allocation5], 16  }
  0x33   :  { %608 = vsyncadd [#allocation5], 4294967280 }
  0x34   :  { %81 = sfence }
  0x35   :  { %v487_v0 = vld [vmem:[#allocation6 + $0x38] sm:$0xff]   ;;  %v617_v1 = vmov 0.0   ;;  %v488_v2 = vld [vmem:[#allocation6 + $0x30] sm:$0xff]   ;;  %vm618_vm0 = vmmov 0   ;;  %v489_v3 = vld [vmem:[#allocation6 + $0x28] sm:$0xff]   ;;  %s225_s2 = sld [smem:[#allocation9]] }
  0x36   :  { %438 = vmatprep.subr.bf16.mxu0 %v617_v1  ;;  %458 = vmatprep.subr.bf16.mxu1 %v617_v1  ;;  %v490_v4 = vld [vmem:[#allocation6 + $0x20] sm:$0xff]   ;;  %v491_v5 = vld [vmem:[#allocation6 + $0x18] sm:$0xff]   ;;  %v492_v6 = vld [vmem:[#allocation6 + $0x10] sm:$0xff]   ;;  %s619_s30 = smov [#allocation10]  }
  0x37   :  { %439 = vmatpush3.bf16.msra.mxu0 %v487_v0  ;;  %454 = vmatprep.mubr.msk.bf16.mxu0 %vm618_vm0, %v617_v1  ;;  %v493_v7 = vld [vmem:[#allocation6 + $0x8] sm:$0xff]   ;;  %v494_v8 = vld [vmem:[#allocation6] sm:$0xff]   ;;  %v83_v9 = vld [vmem:[#allocation2] sm:$0xff]  ;;  %s389_s9 = sshll.u32 %s619_s30, 4  ;;  %s390_s9 = int_to_ptr.vmem [resolvable:$true] %s389_s9 }
  0x38   :  { %440 = vmatprep.subr.bf16.mxu0 %v617_v1  ;;  %474 = vmatprep.mubr.msk.bf16.mxu1 %vm618_vm0, %v617_v1  ;;  %v84_v10 = vpack.c.bf16 %v83_v9, %v83_v9  ;;  %v495_v11 = vld [vmem:[#allocation8 + $0x38] sm:$0xff]   ;;  %v496_v12 = vld [vmem:[#allocation8 + $0x30] sm:$0xff]   ;;  %v497_v13 = vld [vmem:[#allocation8 + $0x28] sm:$0xff]   ;;  %s583_s10 = scalar_lea.vmem %s390_s9, 128  ;;  %p588_p7 = scmp.lt.s32.totalorder %s390_s9, %s390_s9 }
  0x39   :  { %459 = vmatpush3.bf16.msra.mxu1 %v495_v11  ;;  %v408_v36 = vld [vmem:[%s713_s3] ss:$0 sm:$0xff]  ;;  %v498_v45 = vld [vmem:[#allocation8 + $0x20] sm:$0xff]   ;;  %v500_v47 = vld [vmem:[#allocation8 + $0x10] sm:$0xff]   ;;  %p584_p6 = scmp.ne.s32.totalorder %s390_s9, %s583_s10  ;;  %p589_p8 = scmp.lt.s32.totalorder %s583_s10, %s583_s10 }
  0x3a   :  { %460 = vmatprep.subr.bf16.mxu1 %v617_v1  ;;  %v409_v38 = vld [vmem:[%s715_s5] ss:$0 sm:$0xff]  ;;  %v501_v48 = vld [vmem:[#allocation8 + $0x8] sm:$0xff]   ;;  %v502_v49 = vld [vmem:[#allocation8] sm:$0xff]  }
  0x3b   :  { %441 = vmatpush3.bf16.msra.mxu0 %v488_v2  ;;  %v227_v40 = vstv %s225_s2  ;;  %v499_v46 = vld [vmem:[#allocation8 + $0x18] sm:$0xff]   ;;  %p590_p9 = por %p589_p8, %p588_p7 }
  0x3c   :  { %442 = vmatprep.subr.bf16.mxu0 %v617_v1 }
  0x3d   :  { %461 = vmatpush3.bf16.msra.mxu1 %v496_v12  ;;  %p591_p10 = pnand %p590_p9, %p584_p6 }
  0x3e   :  { %462 = vmatprep.subr.bf16.mxu1 %v617_v1 }
  0x3f   :  { %443 = vmatpush3.bf16.msra.mxu0 %v489_v3 }
  0x40   :  { %444 = vmatprep.subr.bf16.mxu0 %v617_v1 }
  0x41   :  { %463 = vmatpush3.bf16.msra.mxu1 %v497_v13  ;;  %v418_v13 = vld [vmem:[%s714_s4] ss:$0 sm:$0xff] }
  0x42   :  { %464 = vmatprep.subr.bf16.mxu1 %v617_v1 }
  0x43   :  { %445 = vmatpush3.bf16.msra.mxu0 %v490_v4 }
  0x44   :  { %446 = vmatprep.subr.bf16.mxu0 %v617_v1 }
  0x45   :  { %465 = vmatpush3.bf16.msra.mxu1 %v498_v45 }
  0x46   :  { %466 = vmatprep.subr.bf16.mxu1 %v617_v1 }
  0x47   :  { %447 = vmatpush3.bf16.msra.mxu0 %v491_v5 }
  0x48   :  { %448 = vmatprep.subr.bf16.mxu0 %v617_v1 }
  0x49   :  { %467 = vmatpush3.bf16.msra.mxu1 %v499_v46 }
  0x4a   :  { %468 = vmatprep.subr.bf16.mxu1 %v617_v1 }
  0x4b   :  { %449 = vmatpush3.bf16.msra.mxu0 %v492_v6 }
  0x4c   :  { %450 = vmatprep.subr.bf16.mxu0 %v617_v1 }
  0x4d   :  { %469 = vmatpush3.bf16.msra.mxu1 %v500_v47 }
  0x4e   :  { %470 = vmatprep.subr.bf16.mxu1 %v617_v1 }
  0x4f   :  { %451 = vmatpush3.bf16.msra.mxu0 %v493_v7 }
  0x50   :  { %452 = vmatprep.subr.bf16.mxu0 %v617_v1 }
  0x51   :  { %471 = vmatpush3.bf16.msra.mxu1 %v501_v48 }
  0x52   :  { %472 = vmatprep.subr.bf16.mxu1 %v617_v1 }
  0x53   :  { %453 = vmatpush3.bf16.msra.mxu0 %v494_v8 }
  0x55   :  { %473 = vmatpush3.bf16.msra.mxu1 %v502_v49 }
  0x56   :  { %455 = vmatmul.mubr.bf16.vlgmr.msra.gmra.mxu0 %v84_v10 }
 0x116   :  { %v183_v14 = vpop.f32.mrf.mxu0 }
 0x117   :  { %v189_v15 = vrot.slane %v183_v14, 4 }
 0x118   :  { %v456_v16 = vpop.f32.mrf.mxu0 }
 0x119   :  { %v190_v17 = vadd.f32 %v189_v15, %v183_v14  ;;  %v419_v15 = vld [vmem:[%s716_s6] ss:$0 sm:$0xff] }
 0x11a   :  { %v186_v18 = vpop.f32.mrf.mxu0 }
 0x11b   :  { %v191_v19 = vrot.slane %v190_v17, 2 }
 0x11c   :  { %v457_v20 = vpop.f32.mrf.mxu0 }
 0x11d   :  { %v192_v21 = vadd.f32 %v191_v19, %v190_v17 }
 0x11f   :  { %v193_v22 = vrot.slane %v192_v21, 1 }
 0x121   :  { %v194_v23 = vadd.f32 %v193_v22, %v192_v21 }
 0x123   :  { %v196_v24 = vmul.f32 0.125, %v194_v23 }
 0x125   :  { %v197_v25 = vsub.f32 %v183_v14, %v196_v24 }
 0x127   :  { %v198_v26 = vmul.f32 %v197_v25, %v197_v25 }
 0x129   :  { %v199_v27 = vrot.slane %v198_v26, 4 }
 0x12b   :  { %v200_v28 = vadd.f32 %v199_v27, %v198_v26 }
 0x12d   :  { %v201_v29 = vrot.slane %v200_v28, 2 }
 0x12f   :  { %v202_v30 = vadd.f32 %v201_v29, %v200_v28 }
 0x131   :  { %v203_v31 = vrot.slane %v202_v30, 1 }
 0x133   :  { %v204_v32 = vadd.f32 %v203_v31, %v202_v30 }
 0x135   :  { %v205_v33 = vmul.f32 0.125, %v204_v32 }
 0x137   :  { %v206_v34 = vadd.f32 1e-05, %v205_v33 }
 0x139   :  { %503 = vrsqrt.f32 %v206_v34 }
 0x146   :  { %v504_v35 = vpop.eup %503 }
 0x147   :  { %v208_v37 = vmul.f32 %v504_v35, %v197_v25 }
 0x149   :  { %v216_v39 = vmul.f32 %v408_v36, %v208_v37 }
 0x14b   :  { %v224_v41 = vadd.f32 %v409_v38, %v216_v39 }
 0x14d   :  { %vm226_vm1 = vcmp.gt.f32.partialorder %v224_v41, 0.0  ;;  %v228_v42 = vmul.f32 %v227_v40, %v224_v41 }
 0x14f   :  { %v229_v43 = vsel %vm226_vm1, %v224_v41, %v228_v42 }
 0x150   :  { %v230_v44 = vmul.f32 %v229_v43, %v229_v43 }
 0x152   :  { %231 = vadd.xlane.f32.xlu0 %v230_v44 }
 0x1db   :  { %v232_v50 = vpop.xlane.xlu0 %231 }
 0x1dc   :  { %v233_v51 = vmax.f32 %v232_v50, 1e-24 }
 0x1de   :  { %505 = vrsqrt.f32 %v233_v51 }
 0x1eb   :  { %v506_v52 = vpop.eup %505 }
 0x1ec   :  { %v235_v53 = vmul.f32 %v506_v52, %v229_v43 }
 0x1ee   :  { %v236_v54 = vpack.c.bf16 %v235_v53, %v235_v53 }
 0x1f0   :  { %475 = vmatmul.mubr.bf16.vlgmr.msra.gmra.mxu1 %v236_v54 }
 0x2b0   :  { %v335_v55 = vpop.f32.mrf.mxu1 }
 0x2b1   :  { %v341_v56 = vrot.slane %v335_v55, 4 }
 0x2b2   :  { %v476_v57 = vpop.f32.mrf.mxu1 }
 0x2b3   :  { %v342_v58 = vadd.f32 %v341_v56, %v335_v55 }
 0x2b4   :  { %v338_v59 = vpop.f32.mrf.mxu1 }
 0x2b5   :  { %v343_v60 = vrot.slane %v342_v58, 2 }
 0x2b6   :  { %v477_v61 = vpop.f32.mrf.mxu1 }
 0x2b7   :  { %v344_v62 = vadd.f32 %v343_v60, %v342_v58 }
 0x2b9   :  { %v345_v63 = vrot.slane %v344_v62, 1 }
 0x2bb   :  { %v346_v0 = vadd.f32 %v345_v63, %v344_v62 }
 0x2bd   :  { %v347_v2 = vmul.f32 0.125, %v346_v0 }
 0x2bf   :  { %v348_v1 = vsub.f32 %v335_v55, %v347_v2 }
 0x2c1   :  { %v349_v3 = vmul.f32 %v348_v1, %v348_v1 }
 0x2c3   :  { %v350_v4 = vrot.slane %v349_v3, 4 }
 0x2c5   :  { %v351_v5 = vadd.f32 %v350_v4, %v349_v3 }
 0x2c7   :  { %v352_v6 = vrot.slane %v351_v5, 2 }
 0x2c9   :  { %v353_v7 = vadd.f32 %v352_v6, %v351_v5 }
 0x2cb   :  { %v354_v8 = vrot.slane %v353_v7, 1 }
 0x2cd   :  { %v355_v9 = vadd.f32 %v354_v8, %v353_v7 }
 0x2cf   :  { %v356_v10 = vmul.f32 0.125, %v355_v9 }
 0x2d1   :  { %v357_v11 = vadd.f32 1e-05, %v356_v10 }
 0x2d3   :  { %507 = vrsqrt.f32 %v357_v11 }
 0x2e0   :  { %v508_v12 = vpop.eup %507 }
 0x2e1   :  { %v359_v14 = vmul.f32 %v508_v12, %v348_v1 }
 0x2e3   :  { %v367_v16 = vmul.f32 %v418_v13, %v359_v14 }
 0x2e5   :  { %v375_v17 = vadd.f32 %v419_v15, %v367_v16 }
 0x2e7   :  { %v376_v18 = vmul.f32 %v375_v17, %v375_v17 }
 0x2e9   :  { %377 = vadd.xlane.f32.xlu0 %v376_v18 }
 0x372   :  { %v378_v19 = vpop.xlane.xlu0 %377 }
 0x373   :  { %v379_v20 = vmax.f32 %v378_v19, 1e-24 }
 0x375   :  { %509 = vrsqrt.f32 %v379_v20 }
 0x382   :  { %v510_v21 = vpop.eup %509 }
 0x383   :  { %v381_v22 = vmul.f32 %v510_v21, %v375_v17 }
 0x385   :  { %382 = vst [vmem:[#allocation10] sm:$0xff] %v381_v22 }
 0x386   :  { %594 = shalt.err (!%p591_p10)
}
 0x387   :  { %392 = dma.vmem_to_hbm [thread:$0]  %s390_s9, 128, %s718_s8, [#allocation4]  }
 0x388   :  { %609 = dma.done.wait [#allocation4], 128  }
 0x389   :  { %610 = vsyncadd [#allocation4], 4294967168 }
 0x38a   :  { %396 = vsyncpa [#allocation3], 1 }
 0x38b   :  { %397 = vsyncpa [#allocation7], 1 }
 0x38c   :  { %398 = vsyncpa [#allocation4], 1 }
 0x38d   :  { %399 = vsyncpa [#allocation5], 1 }

</bundles_post_ra>
